<compile_context>
chip_gen: v7x
topology: tpu7x:2x2x1
jax: 0.10.0
libtpu: 0.0.40
codegen_flags: <defaults>
</compile_context>

<pallas_src>
import functools

import numpy as np

import jax
import jax.numpy as jnp
from jax.experimental import pallas as pl
from jax.experimental.pallas import tpu as pltpu

_LANE = 128      # lane width: hidden feature dims are padded to this
_SUBLANE = 8     # sublane width: row tiles are multiples of this


def _round_up(x, m):
    return ((x + m - 1) // m) * m


def _pick_tm(n_rows, cap=512):
    """Row-tile size: multiple of 8, <= cap, and >=2 grid steps when possible."""
    n8 = _round_up(max(n_rows, 1), _SUBLANE)
    if n8 <= _SUBLANE:
        return _SUBLANE
    tm = min(cap, _round_up(pl.cdiv(n8, 2), _SUBLANE))  # aim for >=2 steps (v7x megacore)
    return max(tm, _SUBLANE)


# --------------------------------------------------------------------------- #
# Kernel
# --------------------------------------------------------------------------- #
def _fused_mlp_kernel(*refs, num_layers):
    """refs = (x_ref, w0, b0, w1, b1, ..., w_{L-1}, b_{L-1}, o_ref).

    Weights are bf16 (pre-cast at prepare time); biases are f32.  Matmuls run on
    the MXU in bf16 with f32 accumulation; bias add + ReLU happen in f32; the
    activation is cast back to bf16 before feeding the next matmul.
    """
    x_ref = refs[0]
    o_ref = refs[-1]
    wb = refs[1:-1]

    h = x_ref[...].astype(jnp.bfloat16)
    for layer in range(num_layers):
        w = wb[2 * layer][...]                       # bf16 [K, F_out(_padded)]
        b = wb[2 * layer + 1][...]                   # f32  [1, F_out(_padded)]
        y = jnp.dot(h, w, preferred_element_type=jnp.float32) + b
        if layer < num_layers - 1:
            h = jnp.maximum(y, 0.0).astype(jnp.bfloat16)   # ReLU (f32) -> bf16
        else:
            h = y                                          # last layer: no ReLU
    o_ref[...] = h.astype(o_ref.dtype)


# --------------------------------------------------------------------------- #
# Param preparation (done ONCE, off the hot path)
# --------------------------------------------------------------------------- #
def prepare_mlp_encoder_params(params, *, compute_dtype=jnp.bfloat16):
    """Pad hidden feature dims to 128 lanes and cast weights to bf16, once.

    params: list of (w[F_in, F_out], b[1, F_out]) in f32 (w is the transpose of
    the PyTorch nn.Linear weight).  The first layer keeps its true K (x is fed
    unpadded); the last layer keeps its true F_out (output written at true width).
    Zero padding is exact: padded K rows are 0, padded bias lanes are 0, and
    ReLU(0) = 0, so padded hidden lanes stay 0 and contribute nothing.
    """
    num_layers = len(params)
    prepared = []
    for li, (w, b) in enumerate(params):
        fi, fo = w.shape
        fi_p = fi if li == 0 else _round_up(fi, _LANE)
        fo_p = fo if li == num_layers - 1 else _round_up(fo, _LANE)
        w_p = jnp.pad(w, ((0, fi_p - fi), (0, fo_p - fo))).astype(compute_dtype)
        b_p = jnp.pad(jnp.reshape(b, (1, -1)).astype(jnp.float32),
                      ((0, 0), (0, fo_p - fo)))
        prepared.append((w_p, b_p))
    return prepared


# --------------------------------------------------------------------------- #
# Forward pass
# --------------------------------------------------------------------------- #
def mlp_encoder_forward(prepared_params, x, edge_index, *, tm_cap=512, out_dtype=None):
    """Fused forward pass.  prepared_params from prepare_mlp_encoder_params; x: [N, F_in]."""
    del edge_index  # unused by the reference forward pass (as in the PyTorch module)

    N, fin = x.shape
    num_layers = len(prepared_params)
    assert prepared_params[0][0].shape[0] == fin, "x feature dim != first-layer K"
    out_f = int(prepared_params[-1][0].shape[1])
    out_dtype = out_dtype or x.dtype

    tm = _pick_tm(N, tm_cap)
    grid = (pl.cdiv(N, tm),)     # last block may be partial: OOB rows are discarded

    flat = [a for wb in prepared_params for a in wb]   # w0, b0, w1, b1, ...

    # ---- scheduling hints -------------------------------------------------
    flops = 2 * N * sum(int(w.shape[0]) * int(w.shape[1]) for w, _ in prepared_params)
    bytes_accessed = (int(x.size) * x.dtype.itemsize
                      + sum(int(a.size) * a.dtype.itemsize for a in flat)
                      + N * out_f * np.dtype(out_dtype).itemsize)
    cost = pl.CostEstimate(flops=flops, transcendentals=0,
                           bytes_accessed=bytes_accessed)

    # ---- VMEM budget (v7x has only 64 MiB physical; leave headroom) --------
    weight_bytes = sum(int(a.size) * a.dtype.itemsize for a in flat)
    widest = max(int(w.shape[1]) for w, _ in prepared_params)
    act_bytes = tm * widest * 4                       # f32 intermediate activations
    io_bytes = 2 * (tm * fin + tm * out_f) * 4        # double-buffered x / out tiles
    vmem_limit = int(min(48 << 20,
                         max(16 << 20, 2 * weight_bytes + 4 * act_bytes + io_bytes)))

    kernel = functools.partial(_fused_mlp_kernel, num_layers=num_layers)

    def run(single_buffer_weights):
        # Weights/biases have constant index maps -> they stay resident; single
        # buffering halves their VMEM footprint (important on v7x's 64 MiB).
        wb_kwargs = ({"pipeline_mode": pl.Buffered(1)}
                     if single_buffer_weights else {})
        in_specs = [pl.BlockSpec((tm, fin), lambda i: (i, 0))]     # x: rows tiled, unpadded lanes
        for arr in flat:
            in_specs.append(pl.BlockSpec(arr.shape, lambda i: (0, 0), **wb_kwargs))
        out_spec = pl.BlockSpec((tm, out_f), lambda i: (i, 0))      # true-width output

        out = pl.pallas_call(
            kernel,
            out_shape=jax.ShapeDtypeStruct((N, out_f), out_dtype),
            grid=grid,
            in_specs=in_specs,
            out_specs=out_spec,
            compiler_params=pltpu.CompilerParams(
                dimension_semantics=("parallel",),   # row tiles shard across v7x TCs
                vmem_limit_bytes=vmem_limit,
            ),
            cost_estimate=cost,
        )(x, *flat)
        return jax.block_until_ready(out)

    try:
        return run(single_buffer_weights=True)
    except Exception:
        # pl.Buffered(1) unsupported on this jax/Mosaic build -> default buffering.
        return run(single_buffer_weights=False)


# --------------------------------------------------------------------------- #
# Param init + references
# --------------------------------------------------------------------------- #
def init_mlp_encoder_params(key, in_features, hidden_dims):
    """Deterministic synthetic params mirroring MLPEncoder.__init__ layer shapes.

    NOTE: weights here are stored as [F_in, F_out]; real PyTorch Linear weights
    ([F_out, F_in]) must be transposed before use.
    """
    dims = [in_features] + list(hidden_dims)
    layer_dims = [(dims[i], dims[i + 1]) for i in range(len(hidden_dims) - 1)]
    layer_dims.append((dims[-2], dims[-1]))

    params = []
    for (fi, fo) in layer_dims:
        key, kw, kb = jax.random.split(key, 3)
        w = (jax.random.normal(kw, (fi, fo), dtype=jnp.float32)
             * (1.0 / jnp.sqrt(float(fi))))
        b = jax.random.normal(kb, (1, fo), dtype=jnp.float32) * 0.01
        params.append((w, b))
    return params


def mlp_encoder_reference(params, x):
    """Pure-JAX f32 reference (exact module semantics)."""
    for (w, b) in params[:-1]:
        x = jnp.maximum(x @ w + b, 0.0)
    w, b = params[-1]
    return x @ w + b


def mlp_encoder_reference_bf16(params, x):
    """Pure-JAX reference matching the kernel's bf16-matmul / f32-accumulate recipe."""
    h = x.astype(jnp.bfloat16)
    y = None
    for li, (w, b) in enumerate(params):
        y = jnp.dot(h, w.astype(jnp.bfloat16),
                    preferred_element_type=jnp.float32) + jnp.reshape(b, (1, -1))
        if li < len(params) - 1:
            h = jnp.maximum(y, 0.0).astype(jnp.bfloat16)
    return y


# --------------------------------------------------------------------------- #
if __name__ == "__main__":
    key = jax.random.PRNGKey(0)

    # Small shapes consistent with the module's forward.
    num_nodes = 8
    in_features = 16
    hidden_dims = [32, 32, 8]   # 3 Linear layers total

    kx, kp, kx2, kx3 = jax.random.split(key, 4)
    x = jax.random.normal(kx, (num_nodes, in_features), dtype=jnp.float32)
    # Dummy edge_index (unused by the forward pass, as in the PyTorch module).
    edge_index = jnp.zeros((2, 12), dtype=jnp.int32)

    params = init_mlp_encoder_params(kp, in_features, hidden_dims)
    prepared = prepare_mlp_encoder_params(params)   # pad + bf16-cast ONCE

    def check(xv):
        out = mlp_encoder_forward(prepared, xv, edge_index)
        assert out.shape == (xv.shape[0], hidden_dims[-1]), out.shape
        # Tight check vs a reference using the identical bf16/f32 recipe.
        ref_m = mlp_encoder_reference_bf16(params, xv)
        assert jnp.allclose(out, ref_m, atol=2e-3, rtol=2e-3), "mismatch vs bf16-matched ref"
        # Loose check vs the exact f32 module semantics (bf16 matmul tolerance).
        ref_f = mlp_encoder_reference(params, xv)
        assert jnp.allclose(out, ref_f, atol=1e-1, rtol=1e-1), "mismatch vs f32 reference"

    # 1) tiny node count (single tile)
    check(x)

    # 2) node count giving a multi-step grid with no wasted rows (384 -> 2 x 192)
    x2 = jax.random.normal(kx2, (384, in_features), dtype=jnp.float32)
    check(x2)

    # 3) node count that exercises a partial last row-tile (masked writeback)
    x3 = jax.random.normal(kx3, (500, in_features), dtype=jnp.float32)
    check(x3)

    print("KERNEL_OK")
</pallas_src>

<mosaic_0001>
module attributes {stable_mosaic.version = 11 : i64} {
  func.func @_fused_mlp_kernel(%arg0: i32, %arg1: memref<8x16xf32, #tpu.memory_space<vmem>>, %arg2: memref<16x128xbf16, #tpu.memory_space<vmem>>, %arg3: memref<1x128xf32, #tpu.memory_space<vmem>>, %arg4: memref<128x128xbf16, #tpu.memory_space<vmem>>, %arg5: memref<1x128xf32, #tpu.memory_space<vmem>>, %arg6: memref<128x8xbf16, #tpu.memory_space<vmem>>, %arg7: memref<1x8xf32, #tpu.memory_space<vmem>>, %arg8: memref<8x8xf32, #tpu.memory_space<vmem>>) attributes {dimension_semantics = [#tpu.dimension_semantics<parallel>], iteration_bounds = array<i64: 1>, scalar_prefetch = 0 : i64, scratch_operands = 0 : i64, tpu.core_type = #tpu.core_type<tc>, window_params = [{transform_indices = @transform_0, window_bounds = array<i64: 8, 16>}, {pipeline_mode = #tpu.pipeline_mode<synchronous>, transform_indices = @transform_1, window_bounds = array<i64: 16, 128>}, {pipeline_mode = #tpu.pipeline_mode<synchronous>, transform_indices = @transform_2, window_bounds = array<i64: 1, 128>}, {pipeline_mode = #tpu.pipeline_mode<synchronous>, transform_indices = @transform_3, window_bounds = array<i64: 128, 128>}, {pipeline_mode = #tpu.pipeline_mode<synchronous>, transform_indices = @transform_4, window_bounds = array<i64: 1, 128>}, {pipeline_mode = #tpu.pipeline_mode<synchronous>, transform_indices = @transform_5, window_bounds = array<i64: 128, 8>}, {pipeline_mode = #tpu.pipeline_mode<synchronous>, transform_indices = @transform_6, window_bounds = array<i64: 1, 8>}, {transform_indices = @transform_7, window_bounds = array<i64: 8, 8>}]} {
    %c0 = arith.constant 0 : index
    %c0_0 = arith.constant 0 : index
    %0 = vector.load %arg1[%c0, %c0_0] : memref<8x16xf32, #tpu.memory_space<vmem>>, vector<8x16xf32>
    %1 = arith.truncf %0 : vector<8x16xf32> to vector<8x16xbf16>
    %c0_1 = arith.constant 0 : index
    %c0_2 = arith.constant 0 : index
    %2 = vector.load %arg2[%c0_1, %c0_2] : memref<16x128xbf16, #tpu.memory_space<vmem>>, vector<16x128xbf16>
    %c0_3 = arith.constant 0 : index
    %c0_4 = arith.constant 0 : index
    %3 = vector.load %arg3[%c0_3, %c0_4] : memref<1x128xf32, #tpu.memory_space<vmem>>, vector<1x128xf32>
    %cst = arith.constant dense<0.000000e+00> : vector<8x128xf32>
    %4 = tpu.matmul %1, %2, %cst {dimension_numbers = #tpu.dot_dimension_numbers<[1], [0], [0], [1], [0, 0, 1, 1], [], []>} : vector<8x16xbf16>, vector<16x128xbf16>, vector<8x128xf32> -> vector<8x128xf32>
    %5 = vector.broadcast %3 : vector<1x128xf32> to vector<8x128xf32>
    %6 = arith.addf %4, %5 : vector<8x128xf32>
    %cst_5 = arith.constant 0.000000e+00 : f32
    %7 = vector.broadcast %cst_5 : f32 to vector<8x128xf32>
    %8 = arith.maximumf %6, %7 : vector<8x128xf32>
    %9 = arith.truncf %8 : vector<8x128xf32> to vector<8x128xbf16>
    %c0_6 = arith.constant 0 : index
    %c0_7 = arith.constant 0 : index
    %10 = vector.load %arg4[%c0_6, %c0_7] : memref<128x128xbf16, #tpu.memory_space<vmem>>, vector<128x128xbf16>
    %c0_8 = arith.constant 0 : index
    %c0_9 = arith.constant 0 : index
    %11 = vector.load %arg5[%c0_8, %c0_9] : memref<1x128xf32, #tpu.memory_space<vmem>>, vector<1x128xf32>
    %cst_10 = arith.constant dense<0.000000e+00> : vector<8x128xf32>
    %12 = tpu.matmul %9, %10, %cst_10 {dimension_numbers = #tpu.dot_dimension_numbers<[1], [0], [0], [1], [0, 0, 1, 1], [], []>} : vector<8x128xbf16>, vector<128x128xbf16>, vector<8x128xf32> -> vector<8x128xf32>
    %13 = vector.broadcast %11 : vector<1x128xf32> to vector<8x128xf32>
    %14 = arith.addf %12, %13 : vector<8x128xf32>
    %cst_11 = arith.constant 0.000000e+00 : f32
    %15 = vector.broadcast %cst_11 : f32 to vector<8x128xf32>
    %16 = arith.maximumf %14, %15 : vector<8x128xf32>
    %17 = arith.truncf %16 : vector<8x128xf32> to vector<8x128xbf16>
    %c0_12 = arith.constant 0 : index
    %c0_13 = arith.constant 0 : index
    %18 = vector.load %arg6[%c0_12, %c0_13] : memref<128x8xbf16, #tpu.memory_space<vmem>>, vector<128x8xbf16>
    %c0_14 = arith.constant 0 : index
    %c0_15 = arith.constant 0 : index
    %19 = vector.load %arg7[%c0_14, %c0_15] : memref<1x8xf32, #tpu.memory_space<vmem>>, vector<1x8xf32>
    %cst_16 = arith.constant dense<0.000000e+00> : vector<8x8xf32>
    %20 = tpu.matmul %17, %18, %cst_16 {dimension_numbers = #tpu.dot_dimension_numbers<[1], [0], [0], [1], [0, 0, 1, 1], [], []>} : vector<8x128xbf16>, vector<128x8xbf16>, vector<8x8xf32> -> vector<8x8xf32>
    %21 = vector.broadcast %19 : vector<1x8xf32> to vector<8x8xf32>
    %22 = arith.addf %20, %21 : vector<8x8xf32>
    %c0_17 = arith.constant 0 : index
    %c0_18 = arith.constant 0 : index
    %23 = vector.load %arg8[%c0_17, %c0_18] : memref<8x8xf32, #tpu.memory_space<vmem>>, vector<8x8xf32>
    tpu.vector_store %arg8[%c0_17, %c0_18], %22 {strides = array<i32>} : memref<8x8xf32, #tpu.memory_space<vmem>>, vector<8x8xf32>,
    return
  }
  func.func @transform_0(%arg0: i32) -> (i32, i32) {
    %c0_i32 = arith.constant 0 : i32
    %c0_i32_0 = arith.constant 0 : i32
    return %arg0, %c0_i32 : i32, i32
  }
  func.func @transform_1(%arg0: i32) -> (i32, i32) {
    %c0_i32 = arith.constant 0 : i32
    %c0_i32_0 = arith.constant 0 : i32
    %c0_i32_1 = arith.constant 0 : i32
    return %c0_i32, %c0_i32_0 : i32, i32
  }
  func.func @transform_2(%arg0: i32) -> (i32, i32) {
    %c0_i32 = arith.constant 0 : i32
    %c0_i32_0 = arith.constant 0 : i32
    %c0_i32_1 = arith.constant 0 : i32
    return %c0_i32, %c0_i32_0 : i32, i32
  }
  func.func @transform_3(%arg0: i32) -> (i32, i32) {
    %c0_i32 = arith.constant 0 : i32
    %c0_i32_0 = arith.constant 0 : i32
    %c0_i32_1 = arith.constant 0 : i32
    return %c0_i32, %c0_i32_0 : i32, i32
  }
  func.func @transform_4(%arg0: i32) -> (i32, i32) {
    %c0_i32 = arith.constant 0 : i32
    %c0_i32_0 = arith.constant 0 : i32
    %c0_i32_1 = arith.constant 0 : i32
    return %c0_i32, %c0_i32_0 : i32, i32
  }
  func.func @transform_5(%arg0: i32) -> (i32, i32) {
    %c0_i32 = arith.constant 0 : i32
    %c0_i32_0 = arith.constant 0 : i32
    %c0_i32_1 = arith.constant 0 : i32
    return %c0_i32, %c0_i32_0 : i32, i32
  }
  func.func @transform_6(%arg0: i32) -> (i32, i32) {
    %c0_i32 = arith.constant 0 : i32
    %c0_i32_0 = arith.constant 0 : i32
    %c0_i32_1 = arith.constant 0 : i32
    return %c0_i32, %c0_i32_0 : i32, i32
  }
  func.func @transform_7(%arg0: i32) -> (i32, i32) {
    %c0_i32 = arith.constant 0 : i32
    %c0_i32_0 = arith.constant 0 : i32
    return %arg0, %c0_i32 : i32, i32
  }
}

module attributes {stable_mosaic.version = 11 : i64} {
  func.func @_fused_mlp_kernel(%arg0: i32, %arg1: memref<8x16xf32, #tpu.memory_space<vmem>>, %arg2: memref<16x128xbf16, #tpu.memory_space<vmem>>, %arg3: memref<1x128xf32, #tpu.memory_space<vmem>>, %arg4: memref<128x128xbf16, #tpu.memory_space<vmem>>, %arg5: memref<1x128xf32, #tpu.memory_space<vmem>>, %arg6: memref<128x8xbf16, #tpu.memory_space<vmem>>, %arg7: memref<1x8xf32, #tpu.memory_space<vmem>>, %arg8: memref<8x8xf32, #tpu.memory_space<vmem>>) attributes {dimension_semantics = [#tpu.dimension_semantics<parallel>], iteration_bounds = array<i64: 1>, scalar_prefetch = 0 : i64, scratch_operands = 0 : i64, tpu.core_type = #tpu.core_type<tc>, window_params = [{transform_indices = @transform_0, window_bounds = array<i64: 8, 16>}, {pipeline_mode = #tpu.pipeline_mode<synchronous>, transform_indices = @transform_1, window_bounds = array<i64: 16, 128>}, {pipeline_mode = #tpu.pipeline_mode<synchronous>, transform_indices = @transform_2, window_bounds = array<i64: 1, 128>}, {pipeline_mode = #tpu.pipeline_mode<synchronous>, transform_indices = @transform_3, window_bounds = array<i64: 128, 128>}, {pipeline_mode = #tpu.pipeline_mode<synchronous>, transform_indices = @transform_4, window_bounds = array<i64: 1, 128>}, {pipeline_mode = #tpu.pipeline_mode<synchronous>, transform_indices = @transform_5, window_bounds = array<i64: 128, 8>}, {pipeline_mode = #tpu.pipeline_mode<synchronous>, transform_indices = @transform_6, window_bounds = array<i64: 1, 8>}, {transform_indices = @transform_7, window_bounds = array<i64: 8, 8>}]} {
    %c0 = arith.constant 0 : index
    %c0_0 = arith.constant 0 : index
    %0 = vector.load %arg1[%c0, %c0_0] : memref<8x16xf32, #tpu.memory_space<vmem>>, vector<8x16xf32>
    %1 = arith.truncf %0 : vector<8x16xf32> to vector<8x16xbf16>
    %c0_1 = arith.constant 0 : index
    %c0_2 = arith.constant 0 : index
    %2 = vector.load %arg2[%c0_1, %c0_2] : memref<16x128xbf16, #tpu.memory_space<vmem>>, vector<16x128xbf16>
    %c0_3 = arith.constant 0 : index
    %c0_4 = arith.constant 0 : index
    %3 = vector.load %arg3[%c0_3, %c0_4] : memref<1x128xf32, #tpu.memory_space<vmem>>, vector<1x128xf32>
    %cst = arith.constant dense<0.000000e+00> : vector<8x128xf32>
    %4 = tpu.matmul %1, %2, %cst {dimension_numbers = #tpu.dot_dimension_numbers<[1], [0], [0], [1], [0, 0, 1, 1], [], []>} : vector<8x16xbf16>, vector<16x128xbf16>, vector<8x128xf32> -> vector<8x128xf32>
    %5 = vector.broadcast %3 : vector<1x128xf32> to vector<8x128xf32>
    %6 = arith.addf %4, %5 : vector<8x128xf32>
    %cst_5 = arith.constant 0.000000e+00 : f32
    %7 = vector.broadcast %cst_5 : f32 to vector<8x128xf32>
    %8 = arith.maximumf %6, %7 : vector<8x128xf32>
    %9 = arith.truncf %8 : vector<8x128xf32> to vector<8x128xbf16>
    %c0_6 = arith.constant 0 : index
    %c0_7 = arith.constant 0 : index
    %10 = vector.load %arg4[%c0_6, %c0_7] : memref<128x128xbf16, #tpu.memory_space<vmem>>, vector<128x128xbf16>
    %c0_8 = arith.constant 0 : index
    %c0_9 = arith.constant 0 : index
    %11 = vector.load %arg5[%c0_8, %c0_9] : memref<1x128xf32, #tpu.memory_space<vmem>>, vector<1x128xf32>
    %cst_10 = arith.constant dense<0.000000e+00> : vector<8x128xf32>
    %12 = tpu.matmul %9, %10, %cst_10 {dimension_numbers = #tpu.dot_dimension_numbers<[1], [0], [0], [1], [0, 0, 1, 1], [], []>} : vector<8x128xbf16>, vector<128x128xbf16>, vector<8x128xf32> -> vector<8x128xf32>
    %13 = vector.broadcast %11 : vector<1x128xf32> to vector<8x128xf32>
    %14 = arith.addf %12, %13 : vector<8x128xf32>
    %cst_11 = arith.constant 0.000000e+00 : f32
    %15 = vector.broadcast %cst_11 : f32 to vector<8x128xf32>
    %16 = arith.maximumf %14, %15 : vector<8x128xf32>
    %17 = arith.truncf %16 : vector<8x128xf32> to vector<8x128xbf16>
    %c0_12 = arith.constant 0 : index
    %c0_13 = arith.constant 0 : index
    %18 = vector.load %arg6[%c0_12, %c0_13] : memref<128x8xbf16, #tpu.memory_space<vmem>>, vector<128x8xbf16>
    %c0_14 = arith.constant 0 : index
    %c0_15 = arith.constant 0 : index
    %19 = vector.load %arg7[%c0_14, %c0_15] : memref<1x8xf32, #tpu.memory_space<vmem>>, vector<1x8xf32>
    %cst_16 = arith.constant dense<0.000000e+00> : vector<8x8xf32>
    %20 = tpu.matmul %17, %18, %cst_16 {dimension_numbers = #tpu.dot_dimension_numbers<[1], [0], [0], [1], [0, 0, 1, 1], [], []>} : vector<8x128xbf16>, vector<128x8xbf16>, vector<8x8xf32> -> vector<8x8xf32>
    %21 = vector.broadcast %19 : vector<1x8xf32> to vector<8x8xf32>
    %22 = arith.addf %20, %21 : vector<8x8xf32>
    %c0_17 = arith.constant 0 : index
    %c0_18 = arith.constant 0 : index
    %23 = vector.load %arg8[%c0_17, %c0_18] : memref<8x8xf32, #tpu.memory_space<vmem>>, vector<8x8xf32>
    tpu.vector_store %arg8[%c0_17, %c0_18], %22 {strides = array<i32>} : memref<8x8xf32, #tpu.memory_space<vmem>>, vector<8x8xf32>,
    return
  }
  func.func @transform_0(%arg0: i32) -> (i32, i32) {
    %c0_i32 = arith.constant 0 : i32
    %c0_i32_0 = arith.constant 0 : i32
    return %arg0, %c0_i32 : i32, i32
  }
  func.func @transform_1(%arg0: i32) -> (i32, i32) {
    %c0_i32 = arith.constant 0 : i32
    %c0_i32_0 = arith.constant 0 : i32
    %c0_i32_1 = arith.constant 0 : i32
    return %c0_i32, %c0_i32_0 : i32, i32
  }
  func.func @transform_2(%arg0: i32) -> (i32, i32) {
    %c0_i32 = arith.constant 0 : i32
    %c0_i32_0 = arith.constant 0 : i32
    %c0_i32_1 = arith.constant 0 : i32
    return %c0_i32, %c0_i32_0 : i32, i32
  }
  func.func @transform_3(%arg0: i32) -> (i32, i32) {
    %c0_i32 = arith.constant 0 : i32
    %c0_i32_0 = arith.constant 0 : i32
    %c0_i32_1 = arith.constant 0 : i32
    return %c0_i32, %c0_i32_0 : i32, i32
  }
  func.func @transform_4(%arg0: i32) -> (i32, i32) {
    %c0_i32 = arith.constant 0 : i32
    %c0_i32_0 = arith.constant 0 : i32
    %c0_i32_1 = arith.constant 0 : i32
    return %c0_i32, %c0_i32_0 : i32, i32
  }
  func.func @transform_5(%arg0: i32) -> (i32, i32) {
    %c0_i32 = arith.constant 0 : i32
    %c0_i32_0 = arith.constant 0 : i32
    %c0_i32_1 = arith.constant 0 : i32
    return %c0_i32, %c0_i32_0 : i32, i32
  }
  func.func @transform_6(%arg0: i32) -> (i32, i32) {
    %c0_i32 = arith.constant 0 : i32
    %c0_i32_0 = arith.constant 0 : i32
    %c0_i32_1 = arith.constant 0 : i32
    return %c0_i32, %c0_i32_0 : i32, i32
  }
  func.func @transform_7(%arg0: i32) -> (i32, i32) {
    %c0_i32 = arith.constant 0 : i32
    %c0_i32_0 = arith.constant 0 : i32
    return %arg0, %c0_i32 : i32, i32
  }
}

</mosaic_0001>

<bundles_post_ra>
// kernel: tpu_custom_call.1
= control target key start
LH: loop header
LB: loop body
LE: loop exit
PB: predicated region body
PF: predicated region fallthrough
CT: control target
= control target key end

     0   :  { %12 = vsyncpa [#allocation3], 0  ;;  %s654_s0 = inlined_call_operand.vmem [shape: f32[8,16], index: 0, kind: input, shape index: {}]   ;;  %s655_s1 = inlined_call_operand.hbm [shape: bf16[16,128], index: 1, kind: input, shape index: {}]   ;;  %s656_s2 = inlined_call_operand.vmem [shape: f32[1,128], index: 2, kind: input, shape index: {}]   ;;  %s657_s3 = inlined_call_operand.vmem [shape: bf16[128,128], index: 3, kind: input, shape index: {}]   ;;  %s658_s4 = inlined_call_operand.vmem [shape: f32[1,128], index: 4, kind: input, shape index: {}]   ;;  %s659_s5 = inlined_call_operand.vmem [shape: bf16[128,8], index: 5, kind: input, shape index: {}]   ;;  %s660_s6 = inlined_call_operand.vmem [shape: f32[1,8], index: 6, kind: input, shape index: {}]   ;;  %s661_s7 = inlined_call_operand.hbm [shape: f32[8,8], index: 7, kind: output, shape index: {}]  }
   0x1   :  { %13 = vsyncpa [#allocation4], 0  ;;  %s504_s24 = smov [#allocation2]   ;;  %s456_s28 = scalar_lea.hbm %s655_s1, 128 }
   0x2   :  { %s21_s25 = sshll.u32 %s504_s24, 4  ;;  %p457_p0 = scmp.ne.s32.totalorder %s655_s1, %s456_s28  ;;  %s22_s25 = int_to_ptr.vmem [resolvable:$true] %s21_s25 }
   0x3   :  { %p460_p1 = scmp.lt.u32.totalorder %s456_s28, %s655_s1 }
   0x5   :  { %p462_p2 = pnand %p460_p1, %p457_p0 }
   0x7   :  { %465 = shalt.err (!%p462_p2)
}
   0x8   :  { %s466_s10 = scalar_lea.vmem %s22_s25, 128  ;;  %p471_p4 = scmp.lt.s32.totalorder %s22_s25, %s22_s25 }
   0x9   :  { %p467_p3 = scmp.ne.s32.totalorder %s22_s25, %s466_s10  ;;  %p472_p5 = scmp.lt.s32.totalorder %s466_s10, %s466_s10 }
   0xb   :  { %p473_p6 = por %p472_p5, %p471_p4 }
   0xd   :  { %p474_p7 = pnand %p473_p6, %p467_p3 }
   0xf   :  { %477 = shalt.err (!%p474_p7)
}
  0x10   :  { %s505_s11 = smov 64   ;;  %s506_s12 = smov 4  }
  0x11   :  { %27 = dma.hbm_to_vmem [thread:$0]  %s655_s1, 128, %s22_s25, [#allocation3], %s505_s11, %s505_s11, %s506_s12  }
  0x12   :  { %500 = dma.done.wait [#allocation3], 128  }
  0x13   :  { %501 = vsyncadd [#allocation3], 4294967168  ;;  %v507_v0 = vmov 0.0   ;;  %vm508_vm0 = vmmov 0   ;;  %v439_v1 = vld [vmem:[#allocation2] sm:$0xff]   ;;  %vm59_vm1 = vcmask 130048  }
  0x14   :  { %387 = vmatprep.subr.bf16.mxu0 %v507_v0  ;;  %389 = vmatprep.mubr.msk.bf16.mxu0 %vm508_vm0, %v507_v0  ;;  %v42_v2 = vld [vmem:[%s654_s0] sm:$0xff]  ;;  %v441_v5 = vld [vmem:[%s657_s3 + $0x8] sm:$0xff]   ;;  %v442_v6 = vld [vmem:[%s657_s3 + $0x10] sm:$0xff]   ;;  %s509_s26 = smov [#allocation5]   ;;  %vm329_vm2 = vcmask 64512  }
  0x15   :  { %393 = vmatprep.subr.bf16.mxu1 %v507_v0  ;;  %409 = vmatprep.mubr.msk.bf16.mxu1 %vm508_vm0, %v507_v0  ;;  %v43_v3 = vpack.c.bf16 %v42_v2, %v42_v2  ;;  %v440_v4 = vld [vmem:[%s657_s3] sm:$0xff]   ;;  %v443_v7 = vld [vmem:[%s657_s3 + $0x18] sm:$0xff]   ;;  %v445_v9 = vld [vmem:[%s657_s3 + $0x28] sm:$0xff]   ;;  %s337_s27 = sshll.u32 %s509_s26, 4  ;;  %s338_s27 = int_to_ptr.vmem [resolvable:$true] %s337_s27 }
  0x16   :  { %388 = vmatpush3.bf16.msra.mxu0 %v439_v1  ;;  %394 = vmatpush3.bf16.msra.mxu1 %v440_v4  ;;  %v444_v8 = vld [vmem:[%s657_s3 + $0x20] sm:$0xff]   ;;  %v446_v10 = vld [vmem:[%s657_s3 + $0x30] sm:$0xff]   ;;  %v447_v11 = vld [vmem:[%s657_s3 + $0x38] sm:$0xff]   ;;  %p483_p9 = scmp.lt.s32.totalorder %s338_s27, %s338_s27 }
  0x17   :  { %413 = vmatprep.subr.bf16.mxu0 %v507_v0  ;;  %395 = vmatprep.subr.bf16.mxu1 %v507_v0  ;;  %v448_v12 = vld [vmem:[%s659_s5] sm:$0xff]   ;;  %v449_v13 = vld [vmem:[%s659_s5 + $0x8] sm:$0xff]   ;;  %v450_v14 = vld [vmem:[%s659_s5 + $0x10] sm:$0xff]  }
  0x18   :  { %v451_v15 = vld [vmem:[%s659_s5 + $0x18] sm:$0xff]   ;;  %v452_v16 = vld [vmem:[%s659_s5 + $0x20] sm:$0xff]   ;;  %v453_v17 = vld [vmem:[%s659_s5 + $0x28] sm:$0xff]  }
  0x19   :  { %390 = vmatmul.mubr.msk.bf16.vlgmr.msra.gmra.mrb[0].mxu0 %vm59_vm1, %v43_v3  ;;  %v346_v18 = vld [vmem:[%s656_s2] ss:$0 sm:$0xff]  ;;  %v454_v26 = vld [vmem:[%s659_s5 + $0x30] sm:$0xff]   ;;  %v455_v27 = vld [vmem:[%s659_s5 + $0x38] sm:$0xff]  }
  0x1a   :  { %429 = vmatprep.mubr.msk.bf16.mxu0 %vm508_vm0, %v507_v0  ;;  %396 = vmatpush3.bf16.msra.mxu1 %v441_v5  ;;  %v349_v28 = vld [vmem:[%s658_s4] ss:$0 sm:$0xff]  ;;  %s478_s4 = scalar_lea.vmem %s338_s27, 128 }
  0x1b   :  { %397 = vmatprep.subr.bf16.mxu1 %v507_v0  ;;  %414 = vmatpush3.bf16.msra.mxu0 %v448_v12  ;;  %v358_v36 = vld [vmem:[%s660_s6] ss:$0 sm:$0xff]  ;;  %p479_p8 = scmp.ne.s32.totalorder %s338_s27, %s478_s4  ;;  %p484_p10 = scmp.lt.s32.totalorder %s478_s4, %s478_s4 }
  0x1c   :  { %415 = vmatprep.subr.bf16.mxu0 %v507_v0 }
  0x1d   :  { %p485_p11 = por %p484_p10, %p483_p9 }
  0x1e   :  { %398 = vmatpush3.bf16.msra.mxu1 %v442_v6 }
  0x1f   :  { %399 = vmatprep.subr.bf16.mxu1 %v507_v0  ;;  %416 = vmatpush3.bf16.msra.mxu0 %v449_v13  ;;  %p486_p12 = pnand %p485_p11, %p479_p8 }
  0x20   :  { %417 = vmatprep.subr.bf16.mxu0 %v507_v0 }
  0x22   :  { %400 = vmatpush3.bf16.msra.mxu1 %v443_v7 }
  0x23   :  { %401 = vmatprep.subr.bf16.mxu1 %v507_v0  ;;  %418 = vmatpush3.bf16.msra.mxu0 %v450_v14 }
  0x24   :  { %419 = vmatprep.subr.bf16.mxu0 %v507_v0 }
  0x26   :  { %402 = vmatpush3.bf16.msra.mxu1 %v444_v8 }
  0x27   :  { %403 = vmatprep.subr.bf16.mxu1 %v507_v0  ;;  %420 = vmatpush3.bf16.msra.mxu0 %v451_v15 }
  0x28   :  { %421 = vmatprep.subr.bf16.mxu0 %v507_v0 }
  0x2a   :  { %404 = vmatpush3.bf16.msra.mxu1 %v445_v9 }
  0x2b   :  { %405 = vmatprep.subr.bf16.mxu1 %v507_v0  ;;  %422 = vmatpush3.bf16.msra.mxu0 %v452_v16 }
  0x2c   :  { %423 = vmatprep.subr.bf16.mxu0 %v507_v0 }
  0x2e   :  { %406 = vmatpush3.bf16.msra.mxu1 %v446_v10 }
  0x2f   :  { %407 = vmatprep.subr.bf16.mxu1 %v507_v0  ;;  %424 = vmatpush3.bf16.msra.mxu0 %v453_v17 }
  0x30   :  { %425 = vmatprep.subr.bf16.mxu0 %v507_v0 }
  0x32   :  { %408 = vmatpush3.bf16.msra.mxu1 %v447_v11 }
  0x33   :  { %426 = vmatpush3.bf16.msra.mxu0 %v454_v26 }
  0x34   :  { %427 = vmatprep.subr.bf16.mxu0 %v507_v0 }
  0x37   :  { %428 = vmatpush3.bf16.msra.mxu0 %v455_v27 }
  0xec   :  { %v97_v19 = vpop.f32.mrb[0].mxu0 }
  0xed   :  { %v98_v20 = vadd.f32 %v346_v18, %v97_v19  ;;  %v391_v21 = vpop.f32.mrb[1].mxu0 }
  0xee   :  { %v100_v22 = vpop.f32.mrb[2].mxu0 }
  0xef   :  { %v103_v23 = vmax.f32 %v98_v20, 0.0  ;;  %v392_v24 = vpop.f32.mrb[3].mxu0 }
  0xf1   :  { %v104_v25 = vpack.c.bf16 %v103_v23, %v103_v23 }
  0xf3   :  { %410 = vmatmul.mubr.bf16.vlgmr.msra.gmra.mrb[0].mxu1 %v104_v25 }
 0x1c6   :  { %v210_v29 = vpop.f32.mrb[0].mxu1 }
 0x1c7   :  { %v211_v30 = vadd.f32 %v349_v28, %v210_v29  ;;  %v411_v31 = vpop.f32.mrb[1].mxu1 }
 0x1c8   :  { %v213_v32 = vpop.f32.mrb[2].mxu1 }
 0x1c9   :  { %v216_v33 = vmax.f32 %v211_v30, 0.0  ;;  %v412_v34 = vpop.f32.mrb[3].mxu1 }
 0x1cb   :  { %v217_v35 = vpack.c.bf16 %v216_v33, %v216_v33 }
 0x1cd   :  { %430 = vmatmul.mubr.bf16.vlgmr.msra.gmra.mrb[4].mxu0 %v217_v35 }
 0x2a0   :  { %v323_v37 = vpop.f32.mrb[4].mxu0 }
 0x2a1   :  { %v324_v38 = vadd.f32 %v358_v36, %v323_v37  ;;  %v431_v39 = vpop.f32.mrb[5].mxu0 }
 0x2a2   :  { %v326_v40 = vpop.f32.mrb[6].mxu0 }
 0x2a3   :  { %v432_v41 = vpop.f32.mrb[7].mxu0  ;;  %330 = vst.msk [vmem:[#allocation5] sm:$0xff] %vm329_vm2, %v324_v38 }
 0x2a4   :  { %489 = shalt.err (!%p486_p12)
}
 0x2a5   :  { %s490_s6 = scalar_lea.hbm %s661_s7, 128 }
 0x2a6   :  { %p491_p13 = scmp.ne.s32.totalorder %s661_s7, %s490_s6  ;;  %p494_p0 = scmp.lt.u32.totalorder %s490_s6, %s661_s7 }
 0x2a8   :  { %p496_p1 = pnand %p494_p0, %p491_p13 }
 0x2aa   :  { %499 = shalt.err (!%p496_p1)
}
 0x2ab   :  { %340 = dma.vmem_to_hbm [thread:$0]  %s338_s27, 128, %s661_s7, [#allocation4]  }
 0x2ac   :  { %502 = dma.done.wait [#allocation4], 128  }
 0x2ad   :  { %503 = vsyncadd [#allocation4], 4294967168 }
 0x2ae   :  { %344 = vsyncpa [#allocation3], 1 }
 0x2af   :  { %345 = vsyncpa [#allocation4], 1 }

// kernel: tpu_custom_call.1
= control target key start
LH: loop header
LB: loop body
LE: loop exit
PB: predicated region body
PF: predicated region fallthrough
CT: control target
= control target key end

     0   :  { %12 = vsyncpa [#allocation3], 0  ;;  %s654_s0 = inlined_call_operand.vmem [shape: f32[8,16], index: 0, kind: input, shape index: {}]   ;;  %s655_s1 = inlined_call_operand.hbm [shape: bf16[16,128], index: 1, kind: input, shape index: {}]   ;;  %s656_s2 = inlined_call_operand.vmem [shape: f32[1,128], index: 2, kind: input, shape index: {}]   ;;  %s657_s3 = inlined_call_operand.vmem [shape: bf16[128,128], index: 3, kind: input, shape index: {}]   ;;  %s658_s4 = inlined_call_operand.vmem [shape: f32[1,128], index: 4, kind: input, shape index: {}]   ;;  %s659_s5 = inlined_call_operand.vmem [shape: bf16[128,8], index: 5, kind: input, shape index: {}]   ;;  %s660_s6 = inlined_call_operand.vmem [shape: f32[1,8], index: 6, kind: input, shape index: {}]   ;;  %s661_s7 = inlined_call_operand.hbm [shape: f32[8,8], index: 7, kind: output, shape index: {}]  }
   0x1   :  { %13 = vsyncpa [#allocation4], 0  ;;  %s504_s24 = smov [#allocation2]   ;;  %s456_s28 = scalar_lea.hbm %s655_s1, 128 }
   0x2   :  { %s21_s25 = sshll.u32 %s504_s24, 4  ;;  %p457_p0 = scmp.ne.s32.totalorder %s655_s1, %s456_s28  ;;  %s22_s25 = int_to_ptr.vmem [resolvable:$true] %s21_s25 }
   0x3   :  { %p460_p1 = scmp.lt.u32.totalorder %s456_s28, %s655_s1 }
   0x5   :  { %p462_p2 = pnand %p460_p1, %p457_p0 }
   0x7   :  { %465 = shalt.err (!%p462_p2)
}
   0x8   :  { %s466_s10 = scalar_lea.vmem %s22_s25, 128  ;;  %p471_p4 = scmp.lt.s32.totalorder %s22_s25, %s22_s25 }
   0x9   :  { %p467_p3 = scmp.ne.s32.totalorder %s22_s25, %s466_s10  ;;  %p472_p5 = scmp.lt.s32.totalorder %s466_s10, %s466_s10 }
   0xb   :  { %p473_p6 = por %p472_p5, %p471_p4 }
   0xd   :  { %p474_p7 = pnand %p473_p6, %p467_p3 }
   0xf   :  { %477 = shalt.err (!%p474_p7)
}
  0x10   :  { %s505_s11 = smov 64   ;;  %s506_s12 = smov 4  }
  0x11   :  { %27 = dma.hbm_to_vmem [thread:$0]  %s655_s1, 128, %s22_s25, [#allocation3], %s505_s11, %s505_s11, %s506_s12  }
  0x12   :  { %500 = dma.done.wait [#allocation3], 128  }
  0x13   :  { %501 = vsyncadd [#allocation3], 4294967168  ;;  %v507_v0 = vmov 0.0   ;;  %vm508_vm0 = vmmov 0   ;;  %v439_v1 = vld [vmem:[#allocation2] sm:$0xff]   ;;  %vm59_vm1 = vcmask 130048  }
  0x14   :  { %387 = vmatprep.subr.bf16.mxu0 %v507_v0  ;;  %389 = vmatprep.mubr.msk.bf16.mxu0 %vm508_vm0, %v507_v0  ;;  %v42_v2 = vld [vmem:[%s654_s0] sm:$0xff]  ;;  %v441_v5 = vld [vmem:[%s657_s3 + $0x8] sm:$0xff]   ;;  %v442_v6 = vld [vmem:[%s657_s3 + $0x10] sm:$0xff]   ;;  %s509_s26 = smov [#allocation5]   ;;  %vm329_vm2 = vcmask 64512  }
  0x15   :  { %393 = vmatprep.subr.bf16.mxu1 %v507_v0  ;;  %409 = vmatprep.mubr.msk.bf16.mxu1 %vm508_vm0, %v507_v0  ;;  %v43_v3 = vpack.c.bf16 %v42_v2, %v42_v2  ;;  %v440_v4 = vld [vmem:[%s657_s3] sm:$0xff]   ;;  %v443_v7 = vld [vmem:[%s657_s3 + $0x18] sm:$0xff]   ;;  %v445_v9 = vld [vmem:[%s657_s3 + $0x28] sm:$0xff]   ;;  %s337_s27 = sshll.u32 %s509_s26, 4  ;;  %s338_s27 = int_to_ptr.vmem [resolvable:$true] %s337_s27 }
  0x16   :  { %388 = vmatpush3.bf16.msra.mxu0 %v439_v1  ;;  %394 = vmatpush3.bf16.msra.mxu1 %v440_v4  ;;  %v444_v8 = vld [vmem:[%s657_s3 + $0x20] sm:$0xff]   ;;  %v446_v10 = vld [vmem:[%s657_s3 + $0x30] sm:$0xff]   ;;  %v447_v11 = vld [vmem:[%s657_s3 + $0x38] sm:$0xff]   ;;  %p483_p9 = scmp.lt.s32.totalorder %s338_s27, %s338_s27 }
  0x17   :  { %413 = vmatprep.subr.bf16.mxu0 %v507_v0  ;;  %395 = vmatprep.subr.bf16.mxu1 %v507_v0  ;;  %v448_v12 = vld [vmem:[%s659_s5] sm:$0xff]   ;;  %v449_v13 = vld [vmem:[%s659_s5 + $0x8] sm:$0xff]   ;;  %v450_v14 = vld [vmem:[%s659_s5 + $0x10] sm:$0xff]  }
  0x18   :  { %v451_v15 = vld [vmem:[%s659_s5 + $0x18] sm:$0xff]   ;;  %v452_v16 = vld [vmem:[%s659_s5 + $0x20] sm:$0xff]   ;;  %v453_v17 = vld [vmem:[%s659_s5 + $0x28] sm:$0xff]  }
  0x19   :  { %390 = vmatmul.mubr.msk.bf16.vlgmr.msra.gmra.mrb[0].mxu0 %vm59_vm1, %v43_v3  ;;  %v346_v18 = vld [vmem:[%s656_s2] ss:$0 sm:$0xff]  ;;  %v454_v26 = vld [vmem:[%s659_s5 + $0x30] sm:$0xff]   ;;  %v455_v27 = vld [vmem:[%s659_s5 + $0x38] sm:$0xff]  }
  0x1a   :  { %429 = vmatprep.mubr.msk.bf16.mxu0 %vm508_vm0, %v507_v0  ;;  %396 = vmatpush3.bf16.msra.mxu1 %v441_v5  ;;  %v349_v28 = vld [vmem:[%s658_s4] ss:$0 sm:$0xff]  ;;  %s478_s4 = scalar_lea.vmem %s338_s27, 128 }
  0x1b   :  { %397 = vmatprep.subr.bf16.mxu1 %v507_v0  ;;  %414 = vmatpush3.bf16.msra.mxu0 %v448_v12  ;;  %v358_v36 = vld [vmem:[%s660_s6] ss:$0 sm:$0xff]  ;;  %p479_p8 = scmp.ne.s32.totalorder %s338_s27, %s478_s4  ;;  %p484_p10 = scmp.lt.s32.totalorder %s478_s4, %s478_s4 }
  0x1c   :  { %415 = vmatprep.subr.bf16.mxu0 %v507_v0 }
  0x1d   :  { %p485_p11 = por %p484_p10, %p483_p9 }
  0x1e   :  { %398 = vmatpush3.bf16.msra.mxu1 %v442_v6 }
  0x1f   :  { %399 = vmatprep.subr.bf16.mxu1 %v507_v0  ;;  %416 = vmatpush3.bf16.msra.mxu0 %v449_v13  ;;  %p486_p12 = pnand %p485_p11, %p479_p8 }
  0x20   :  { %417 = vmatprep.subr.bf16.mxu0 %v507_v0 }
  0x22   :  { %400 = vmatpush3.bf16.msra.mxu1 %v443_v7 }
  0x23   :  { %401 = vmatprep.subr.bf16.mxu1 %v507_v0  ;;  %418 = vmatpush3.bf16.msra.mxu0 %v450_v14 }
  0x24   :  { %419 = vmatprep.subr.bf16.mxu0 %v507_v0 }
  0x26   :  { %402 = vmatpush3.bf16.msra.mxu1 %v444_v8 }
  0x27   :  { %403 = vmatprep.subr.bf16.mxu1 %v507_v0  ;;  %420 = vmatpush3.bf16.msra.mxu0 %v451_v15 }
  0x28   :  { %421 = vmatprep.subr.bf16.mxu0 %v507_v0 }
  0x2a   :  { %404 = vmatpush3.bf16.msra.mxu1 %v445_v9 }
  0x2b   :  { %405 = vmatprep.subr.bf16.mxu1 %v507_v0  ;;  %422 = vmatpush3.bf16.msra.mxu0 %v452_v16 }
  0x2c   :  { %423 = vmatprep.subr.bf16.mxu0 %v507_v0 }
  0x2e   :  { %406 = vmatpush3.bf16.msra.mxu1 %v446_v10 }
  0x2f   :  { %407 = vmatprep.subr.bf16.mxu1 %v507_v0  ;;  %424 = vmatpush3.bf16.msra.mxu0 %v453_v17 }
  0x30   :  { %425 = vmatprep.subr.bf16.mxu0 %v507_v0 }
  0x32   :  { %408 = vmatpush3.bf16.msra.mxu1 %v447_v11 }
  0x33   :  { %426 = vmatpush3.bf16.msra.mxu0 %v454_v26 }
  0x34   :  { %427 = vmatprep.subr.bf16.mxu0 %v507_v0 }
  0x37   :  { %428 = vmatpush3.bf16.msra.mxu0 %v455_v27 }
  0xec   :  { %v97_v19 = vpop.f32.mrb[0].mxu0 }
  0xed   :  { %v98_v20 = vadd.f32 %v346_v18, %v97_v19  ;;  %v391_v21 = vpop.f32.mrb[1].mxu0 }
  0xee   :  { %v100_v22 = vpop.f32.mrb[2].mxu0 }
  0xef   :  { %v103_v23 = vmax.f32 %v98_v20, 0.0  ;;  %v392_v24 = vpop.f32.mrb[3].mxu0 }
  0xf1   :  { %v104_v25 = vpack.c.bf16 %v103_v23, %v103_v23 }
  0xf3   :  { %410 = vmatmul.mubr.bf16.vlgmr.msra.gmra.mrb[0].mxu1 %v104_v25 }
 0x1c6   :  { %v210_v29 = vpop.f32.mrb[0].mxu1 }
 0x1c7   :  { %v211_v30 = vadd.f32 %v349_v28, %v210_v29  ;;  %v411_v31 = vpop.f32.mrb[1].mxu1 }
 0x1c8   :  { %v213_v32 = vpop.f32.mrb[2].mxu1 }
 0x1c9   :  { %v216_v33 = vmax.f32 %v211_v30, 0.0  ;;  %v412_v34 = vpop.f32.mrb[3].mxu1 }
 0x1cb   :  { %v217_v35 = vpack.c.bf16 %v216_v33, %v216_v33 }
 0x1cd   :  { %430 = vmatmul.mubr.bf16.vlgmr.msra.gmra.mrb[4].mxu0 %v217_v35 }
 0x2a0   :  { %v323_v37 = vpop.f32.mrb[4].mxu0 }
 0x2a1   :  { %v324_v38 = vadd.f32 %v358_v36, %v323_v37  ;;  %v431_v39 = vpop.f32.mrb[5].mxu0 }
 0x2a2   :  { %v326_v40 = vpop.f32.mrb[6].mxu0 }
 0x2a3   :  { %v432_v41 = vpop.f32.mrb[7].mxu0  ;;  %330 = vst.msk [vmem:[#allocation5] sm:$0xff] %vm329_vm2, %v324_v38 }
 0x2a4   :  { %489 = shalt.err (!%p486_p12)
}
 0x2a5   :  { %s490_s6 = scalar_lea.hbm %s661_s7, 128 }
 0x2a6   :  { %p491_p13 = scmp.ne.s32.totalorder %s661_s7, %s490_s6  ;;  %p494_p0 = scmp.lt.u32.totalorder %s490_s6, %s661_s7 }
 0x2a8   :  { %p496_p1 = pnand %p494_p0, %p491_p13 }
 0x2aa   :  { %499 = shalt.err (!%p496_p1)
}
 0x2ab   :  { %340 = dma.vmem_to_hbm [thread:$0]  %s338_s27, 128, %s661_s7, [#allocation4]  }
 0x2ac   :  { %502 = dma.done.wait [#allocation4], 128  }
 0x2ad   :  { %503 = vsyncadd [#allocation4], 4294967168 }
 0x2ae   :  { %344 = vsyncpa [#allocation3], 1 }
 0x2af   :  { %345 = vsyncpa [#allocation4], 1 }

</bundles_post_ra>
